<compile_context>
chip_gen: v7x
topology: tpu7x:2x2x1
jax: 0.10.0
libtpu: 0.0.40
codegen_flags: <defaults>
</compile_context>

<pallas_src>
import jax
import jax.numpy as jnp
from jax.experimental import pallas as pl
from jax.experimental.pallas import tpu as pltpu


LANE = 128


def _cdiv(a, b):
    return -(-a // b)


def _round_up(x, m):
    return ((x + m - 1) // m) * m


def _sublane_multiple(dtype):
    itemsize = jnp.dtype(dtype).itemsize
    if itemsize >= 4:
        return 8
    if itemsize == 2:
        return 16
    return 32


def _vmem_capacity_bytes():
    """Best-effort physical VMEM query; conservative (v7x, 64 MiB) fallback."""
    try:
        info = pltpu.get_tpu_info()
        for attr in ("vmem_capacity_bytes", "vmem_size_bytes", "vmem_bytes"):
            v = getattr(info, attr, None)
            if v:
                return int(v)
    except Exception:
        pass
    return 64 * 1024 * 1024


def _one_fill_kernel(w_ref, out_ref):
    # w_ref: full (rows_padded, 1) weight column, resident in VMEM once.
    # out_ref: (block_rows, block_cols) output tile for grid step (i, j).
    block_rows = out_ref.shape[0]
    start = pl.multiple_of(pl.program_id(0) * block_rows, block_rows)
    w = w_ref[pl.ds(start, block_rows), :]                      # (block_rows, 1)
    val = w.astype(out_ref.dtype) + jnp.ones((), dtype=out_ref.dtype)
    out_ref[...] = jnp.broadcast_to(val, out_ref.shape)         # lane broadcast


def one_forward(difference, weight):
    """difference: (N, C, H, W) -- only shape/dtype are used.
    weight: scalar or per-channel tensor broadcastable to (C, 1, 1).
    Returns ones_like(difference) + weight."""
    N, C, H, W = difference.shape
    dtype = difference.dtype
    itemsize = jnp.dtype(dtype).itemsize

    rows, cols = N * C, H * W
    sublane = _sublane_multiple(dtype)

    # --- weight validation: must broadcast over the channel axis only -------
    w_arr = jnp.asarray(weight)
    if w_arr.ndim > 3:
        raise ValueError(
            f"weight must be broadcastable to (C, 1, 1); got shape {w_arr.shape}")
    pshape = (1,) * (3 - w_arr.ndim) + tuple(w_arr.shape)
    if pshape[0] not in (1, C) or pshape[1] != 1 or pshape[2] != 1:
        raise ValueError(
            f"weight must be broadcastable to (C, 1, 1); got shape {w_arr.shape}")
    w_chan = jnp.broadcast_to(w_arr.reshape(pshape), (C, 1, 1)).reshape(C)
    w_chan = w_chan.astype(dtype)

    # --- generation-gated per-output-block budget (double-buffered pipeline) -
    vmem_cap = _vmem_capacity_bytes()
    big_vmem = vmem_cap >= (100 << 20)                 # 128-MiB parts (v5e/v6e)
    block_budget = (16 << 20) if big_vmem else (6 << 20)   # v7x stays small

    # --- column tiling (lane-dense, multiples of 128) ------------------------
    cols_aligned = (cols % LANE == 0)
    if cols_aligned:
        max_cols = max(LANE, (block_budget // (sublane * itemsize)) // LANE * LANE)
        block_cols = min(cols, max_cols)
    else:
        # TODO(synk): for huge non-128-multiple H*W, pad cols to a lane-dense
        # slab; here we fall back to a single full-extent column block.
        block_cols = cols

    # --- row tiling (sublane-aligned, cdiv grid) ------------------------------
    max_rows = max(sublane, (block_budget // (block_cols * itemsize)) // sublane * sublane)
    block_rows = rows if rows <= max_rows else max_rows

    n_row = _cdiv(rows, block_rows)
    n_col = _cdiv(cols, block_cols)

    # --- ensure >= 2 grid steps for MiB-scale outputs (feed both v7x TCs) ----
    total_bytes = rows * cols * itemsize
    if total_bytes >= (2 << 20) and n_row * n_col < 2:
        if rows > sublane:
            block_rows = max(sublane, _round_up(_cdiv(rows, 2), sublane))
        elif cols_aligned and cols >= 2 * LANE:
            block_cols = max(LANE, _round_up(cols // 2, LANE))
        n_row = _cdiv(rows, block_rows)
        n_col = _cdiv(cols, block_cols)

    # --- tiny per-row weight column, padded so in-kernel slice is in-bounds --
    rows_padded = n_row * block_rows
    w_rows = jnp.tile(w_chan, N)                               # row n*C + c -> w[c]
    w_rows = jnp.pad(w_rows, (0, rows_padded - rows)).reshape(rows_padded, 1)

    # --- explicit scoped-VMEM limit (2x out block + weight table + slack) ----
    block_bytes = block_rows * block_cols * itemsize
    w_vmem_bytes = _round_up(rows_padded, sublane) * LANE * itemsize
    vmem_limit = 2 * block_bytes + 2 * w_vmem_bytes + (2 << 20)
    vmem_limit = max(vmem_limit, 16 << 20)
    vmem_limit = min(vmem_limit, vmem_cap)

    out2d = pl.pallas_call(
        _one_fill_kernel,
        out_shape=jax.ShapeDtypeStruct((rows, cols), dtype),
        grid_spec=pltpu.PrefetchScalarGridSpec(
            num_scalar_prefetch=0,
            grid=(n_row, n_col),
            in_specs=[
                # whole (tiny) weight column resident in VMEM once; no per-step DMA
                pl.BlockSpec(memory_space=pltpu.MemorySpace.VMEM),
            ],
            out_specs=pl.BlockSpec((block_rows, block_cols), lambda i, j: (i, j)),
        ),
        compiler_params=pltpu.CompilerParams(
            dimension_semantics=("parallel", "parallel"),
            vmem_limit_bytes=int(vmem_limit),
        ),
    )(w_rows)

    return out2d.reshape(N, C, H, W)


if __name__ == "__main__":
    key = jax.random.PRNGKey(0)
    k_diff, k_w = jax.random.split(key)

    N, C, H, W = 2, 4, 16, 16
    # "difference" input (values irrelevant to the output, only shape/dtype)
    difference = jax.random.normal(k_diff, (N, C, H, W), dtype=jnp.float32)
    # Deterministic per-channel weight, broadcastable over NCHW.
    weight = jax.random.normal(k_w, (C, 1, 1), dtype=jnp.float32)

    out = one_forward(difference, weight)
    out = jax.block_until_ready(out)

    # Reference check in plain JAX
    ref = jnp.ones_like(difference) + weight
    assert out.shape == difference.shape
    assert out.dtype == difference.dtype
    assert jnp.allclose(out, ref, atol=1e-6), "mismatch vs reference"

    print("KERNEL_OK")
</pallas_src>

<mosaic_0001>
module attributes {stable_mosaic.version = 11 : i64} {
  func.func @_one_fill_kernel(%arg0: i32, %arg1: i32, %arg2: memref<8x1xf32, #tpu.memory_space<vmem>>, %arg3: memref<8x256xf32, #tpu.memory_space<vmem>>) attributes {dimension_semantics = [#tpu.dimension_semantics<parallel>, #tpu.dimension_semantics<parallel>], iteration_bounds = array<i64: 1, 1>, scalar_prefetch = 0 : i64, scratch_operands = 0 : i64, tpu.core_type = #tpu.core_type<tc>, window_params = [{pipeline_mode = #tpu.pipeline_mode<synchronous>, transform_indices = @transform_0, window_bounds = array<i64: 8, 1>}, {transform_indices = @transform_1, window_bounds = array<i64: 8, 256>}]} {
    %c8_i32 = arith.constant 8 : i32
    %0 = arith.muli %arg0, %c8_i32 : i32
    %1 = tpu.assume_multiple %0, 8 : i32
    %2 = arith.index_cast %1 : i32 to index
    %c0 = arith.constant 0 : index
    %3 = vector.load %arg2[%2, %c0] : memref<8x1xf32, #tpu.memory_space<vmem>>, vector<8x1xf32>
    %cst = arith.constant 1.000000e+00 : f32
    %4 = vector.broadcast %cst : f32 to vector<8x1xf32>
    %5 = arith.addf %3, %4 : vector<8x1xf32>
    %6 = vector.shape_cast %5 : vector<8x1xf32> to vector<8x1xf32>
    %7 = vector.broadcast %6 : vector<8x1xf32> to vector<8x256xf32>
    %c0_0 = arith.constant 0 : index
    %c0_1 = arith.constant 0 : index
    %8 = vector.load %arg3[%c0_0, %c0_1] : memref<8x256xf32, #tpu.memory_space<vmem>>, vector<8x256xf32>
    tpu.vector_store %arg3[%c0_0, %c0_1], %7 {strides = array<i32>} : memref<8x256xf32, #tpu.memory_space<vmem>>, vector<8x256xf32>,
    return
  }
  func.func @transform_0(%arg0: i32, %arg1: i32) -> (i32, i32) {
    %c0_i32 = arith.constant 0 : i32
    %c0_i32_0 = arith.constant 0 : i32
    %c0_i32_1 = arith.constant 0 : i32
    return %c0_i32, %c0_i32_0 : i32, i32
  }
  func.func @transform_1(%arg0: i32, %arg1: i32) -> (i32, i32) {
    %c0_i32 = arith.constant 0 : i32
    return %arg0, %arg1 : i32, i32
  }
}

</mosaic_0001>

<bundles_post_ra>
// kernel: tpu_custom_call.1
= control target key start
LH: loop header
LB: loop body
LE: loop exit
PB: predicated region body
PF: predicated region fallthrough
CT: control target
= control target key end

     0   :  { %s88_s0 = inlined_call_operand.vmem [shape: f32[8,1], index: 0, kind: input, shape index: {}]   ;;  %s89_s1 = inlined_call_operand.hbm [shape: f32[8,256], index: 1, kind: output, shape index: {}]  }
   0x1   :  { %v11_v0 = vld [vmem:[%s88_s0] sm:$0xff] }
   0x2   :  { %6 = vsyncpa [#allocation3], 0  ;;  %v61_v1 = vmov 0   ;;  %v12_v2 = vadd.f32 1.0, %v11_v0  ;;  %s62_s8 = smov [#allocation2]  }
   0x3   :  { %36 = vset.pattern.permute.xlu0 %v61_v1  ;;  %s26_s9 = sshll.u32 %s62_s8, 4  ;;  %s27_s9 = int_to_ptr.vmem [resolvable:$true] %s26_s9 }
   0x4   :  { %15 = vperm.xlu0 %36, %v12_v2   ;;  %s37_s10 = scalar_lea.vmem %s27_s9, 256  ;;  %p42_p1 = scmp.lt.s32.totalorder %s27_s9, %s27_s9 }
   0x5   :  { %p38_p0 = scmp.ne.s32.totalorder %s27_s9, %s37_s10  ;;  %p43_p2 = scmp.lt.s32.totalorder %s37_s10, %s37_s10 }
   0x7   :  { %p44_p3 = por %p43_p2, %p42_p1 }
   0x9   :  { %p45_p4 = pnand %p44_p3, %p38_p0 }
  0x83   :  { %v16_v3 = vpop.permute.xlu0 %15 }
  0x84   :  { %18 = vst [vmem:[#allocation2] sm:$0xff] %v16_v3  ;;  %19 = vst [vmem:[#allocation2 + $0x8] sm:$0xff] %v16_v3 }
  0x85   :  { %48 = shalt.err (!%p45_p4)
}
  0x86   :  { %s49_s12 = scalar_lea.hbm %s89_s1, 256 }
  0x87   :  { %p50_p5 = scmp.ne.s32.totalorder %s89_s1, %s49_s12  ;;  %p53_p6 = scmp.lt.u32.totalorder %s49_s12, %s89_s1 }
  0x89   :  { %p55_p7 = pnand %p53_p6, %p50_p5 }
  0x8b   :  { %58 = shalt.err (!%p55_p7)
}
  0x8c   :  { %29 = dma.vmem_to_hbm [thread:$0]  %s27_s9, 256, %s89_s1, [#allocation3]  }
  0x8d   :  { %59 = dma.done.wait [#allocation3], 256  }
  0x8e   :  { %60 = vsyncadd [#allocation3], 4294967040 }
  0x8f   :  { %33 = vsyncpa [#allocation3], 1 }

</bundles_post_ra>
